<compile_context>
chip_gen: v5e
topology: v5e:2x2
jax: 0.10.0
libtpu: 0.0.40
codegen_flags: <defaults>
</compile_context>

<pallas_src>
import functools

import jax
import jax.numpy as jnp
from jax import lax
from jax.experimental import pallas as pl
from jax.experimental.pallas import tpu as pltpu


def _round_up(x: int, m: int) -> int:
    return ((x + m - 1) // m) * m


def _cdiv(a: int, b: int) -> int:
    return (a + b - 1) // b


@functools.lru_cache(maxsize=None)
def _vmem_capacity_bytes() -> int:
    """Physical VMEM of the attached TPU generation (conservative fallback)."""
    try:
        cap = getattr(pltpu.get_tpu_info(), "vmem_capacity_bytes", None)
        if cap:
            return int(cap)
    except Exception:
        pass
    return 64 << 20  # v7x per-TensorCore budget; safe on every generation


def _stationary_spec(shape):
    """Full-array parameter block.

    Constant block index -> never re-fetched across grid steps.  Where the JAX
    version supports it, request single-buffering (pl.Buffered(1)): stationary
    operands gain nothing from double buffering and this halves their VMEM
    footprint (matters most on v7x's 64 MiB VMEM).
    """
    index_map = lambda i: (0,) * len(shape)
    try:
        return pl.BlockSpec(shape, index_map, pipeline_mode=pl.Buffered(1))
    except Exception:  # pipeline_mode / Buffered(1) unavailable -> default 2-deep
        return pl.BlockSpec(shape, index_map)


def make_encoder_kernel(num_layers: int, latent_dims: int, d_lat_pad: int,
                        split_head: bool, matmul_dtype):
    """Kernel with the hidden-layer loop unrolled at trace time."""

    def kernel(x_ref, *refs):
        # refs = [w1, b1, ..., wL, bL, w_head, b_head, out_ref]
        n_params = 2 * num_layers + 2
        param_refs = refs[:n_params]
        out_ref = refs[n_params]

        h = x_ref[...]  # (tile, d_in), already matmul_dtype
        # Hidden MLP stack: MXU matmul (f32 accumulate) + bias + ReLU (VPU, f32).
        for i in range(num_layers):
            w = param_refs[2 * i][...]
            b = param_refs[2 * i + 1][...]
            acc = jnp.dot(h, w, preferred_element_type=jnp.float32)
            h = jnp.maximum(acc + b, 0.0).astype(matmul_dtype)

        # Fused mu|sigma head: one lane-dense matmul.
        w_head = param_refs[2 * num_layers][...]
        b_head = param_refs[2 * num_layers + 1][...]
        raw = jnp.dot(h, w_head, preferred_element_type=jnp.float32) + b_head

        if split_head:
            # mu block [0, d_lat_pad), sigma block [d_lat_pad, 2*d_lat_pad):
            # both 128-aligned -> exp (EUP) only touches the sigma columns.
            out_ref[:, :d_lat_pad] = raw[:, :d_lat_pad]
            out_ref[:, d_lat_pad:] = jnp.exp(raw[:, d_lat_pad:])
        else:
            # 2*latent <= 128: single 128-wide slab, masked exp on sigma cols.
            col = lax.broadcasted_iota(jnp.int32, raw.shape, 1)
            out_ref[...] = jnp.where(col >= latent_dims, jnp.exp(raw), raw)

    return kernel


def pack_encoder_params(params, num_layers: int, input_dims: int,
                        matmul_dtype=jnp.bfloat16):
    """One-time packing: zero-pad K/N dims to multiples of 128, fuse the mu and
    sigma heads into one (hidden, d_head) slab and cast weights to the matmul
    dtype.  Biases stay f32 (epilogue runs in f32).  Zero padding is exact.
    """
    hidden_dims = params[0].shape[1]
    latent_dims = params[2 * num_layers].shape[1]

    d_in = _round_up(input_dims, 128)
    d_hid = _round_up(hidden_dims, 128)
    split_head = 2 * latent_dims > 128
    d_lat_pad = _round_up(latent_dims, 128)
    d_head = 2 * d_lat_pad if split_head else _round_up(2 * latent_dims, 128)

    packed = []
    for i in range(num_layers):
        w, b = params[2 * i], params[2 * i + 1]
        fan_in = d_in if i == 0 else d_hid
        w_p = jnp.zeros((fan_in, d_hid), matmul_dtype)
        w_p = w_p.at[:w.shape[0], :w.shape[1]].set(w.astype(matmul_dtype))
        b_p = jnp.zeros((1, d_hid), jnp.float32).at[:, :b.shape[1]].set(b)
        packed += [w_p, b_p]

    w_mu, b_mu = params[2 * num_layers + 0], params[2 * num_layers + 1]
    w_sg, b_sg = params[2 * num_layers + 2], params[2 * num_layers + 3]
    sg_off = d_lat_pad if split_head else latent_dims
    w_head = jnp.zeros((d_hid, d_head), matmul_dtype)
    w_head = w_head.at[:w_mu.shape[0], :latent_dims].set(w_mu.astype(matmul_dtype))
    w_head = w_head.at[:w_sg.shape[0], sg_off:sg_off + latent_dims].set(
        w_sg.astype(matmul_dtype))
    b_head = jnp.zeros((1, d_head), jnp.float32)
    b_head = b_head.at[:, :latent_dims].set(b_mu)
    b_head = b_head.at[:, sg_off:sg_off + latent_dims].set(b_sg)
    packed += [w_head, b_head]
    return tuple(packed)


@functools.partial(jax.jit,
                   static_argnames=("num_layers", "latent_dims", "tile_m",
                                    "matmul_dtype"))
def encoder_forward(x, packed, *, num_layers: int, latent_dims: int,
                    tile_m=None, matmul_dtype=jnp.bfloat16):
    """Forward pass.  `packed` is the output of pack_encoder_params (pre-padded,
    pre-cast).  Returns (mu, sigma), each (N, latent_dims) float32."""
    input_dims = x.shape[1]
    x2d = x.reshape(-1, input_dims)           # x.view(-1, x.shape[1])
    n = x2d.shape[0]

    d_in = packed[0].shape[0]
    d_hid = packed[0].shape[1]
    d_head = packed[2 * num_layers].shape[1]
    split_head = 2 * latent_dims > 128
    d_lat_pad = _round_up(latent_dims, 128)

    in_itemsize = jnp.dtype(matmul_dtype).itemsize
    vmem_cap = _vmem_capacity_bytes()
    if tile_m is None:
        tile_m = 512 if vmem_cap >= (96 << 20) else 256  # bigger tiles on v5e/v6e

    # Batch tile: multiple of 16 for bf16 (8 for f32); at least 2 grid steps
    # when the batch allows it (v7x 2-TC sharding); sized to minimize tail
    # padding for ragged batches; capped at tile_m.
    row_align = 16 if in_itemsize < 4 else 8
    steps = max(_cdiv(n, tile_m), 2 if n > row_align else 1)
    tile = max(row_align, _round_up(_cdiv(n, steps), row_align))
    grid = _cdiv(n, tile)
    n_pad = tile * grid

    # Pad the batch directly in the matmul dtype (single pass, no f32 detour).
    x_p = jnp.zeros((n_pad, d_in), matmul_dtype)
    x_p = x_p.at[:n, :input_dims].set(x2d.astype(matmul_dtype))

    kernel = make_encoder_kernel(num_layers, latent_dims, d_lat_pad, split_head,
                                 matmul_dtype)

    x_spec = pl.BlockSpec((tile, d_in), lambda i: (i, 0))
    param_specs = [_stationary_spec(p.shape) for p in packed]
    out_spec = pl.BlockSpec((tile, d_head), lambda i: (i, 0))

    # VMEM budget: double-buffered x/out tiles + single-buffered params +
    # live per-layer activations (f32 accumulator + matmul-dtype copy) + slack.
    param_bytes = sum(int(p.size) * p.dtype.itemsize for p in packed)
    io_bytes = 2 * tile * (d_in * in_itemsize + d_head * 4)
    act_bytes = 2 * tile * d_hid * (4 + in_itemsize)
    est = io_bytes + param_bytes + act_bytes + (2 << 20)
    vmem_limit = int(min(max(est, 16 << 20), int(vmem_cap * 0.85)))

    out = pl.pallas_call(
        kernel,
        out_shape=jax.ShapeDtypeStruct((n_pad, d_head), jnp.float32),
        grid_spec=pltpu.PrefetchScalarGridSpec(
            num_scalar_prefetch=0,
            grid=(grid,),
            in_specs=[x_spec] + param_specs,
            out_specs=out_spec,
        ),
        compiler_params=pltpu.CompilerParams(
            dimension_semantics=("parallel",),   # batch tiles shard across TCs
            vmem_limit_bytes=vmem_limit,
        ),
    )(x_p, *packed)

    mu = out[:n, :latent_dims]
    sigma_off = d_lat_pad if split_head else latent_dims
    sigma = out[:n, sigma_off:sigma_off + latent_dims]
    return mu, sigma


def init_encoder_params(key, input_dims, hidden_dims, latent_dims, num_layers):
    """nn.Linear-style init U(-1/sqrt(fan_in), 1/sqrt(fan_in)).

    Weights stored pre-transposed as (fan_in, fan_out); biases as (1, fan_out).
    """
    params = []
    fan_in = input_dims
    for _ in range(num_layers):
        key, kw, kb = jax.random.split(key, 3)
        bound = 1.0 / (fan_in ** 0.5)
        params.append(jax.random.uniform(kw, (fan_in, hidden_dims), jnp.float32,
                                         -bound, bound))
        params.append(jax.random.uniform(kb, (1, hidden_dims), jnp.float32,
                                         -bound, bound))
        fan_in = hidden_dims
    for _ in range(2):  # mu head, sigma head
        key, kw, kb = jax.random.split(key, 3)
        bound = 1.0 / (fan_in ** 0.5)
        params.append(jax.random.uniform(kw, (fan_in, latent_dims), jnp.float32,
                                         -bound, bound))
        params.append(jax.random.uniform(kb, (1, latent_dims), jnp.float32,
                                         -bound, bound))
    return tuple(params)


def encoder_ref(x, params, num_layers):
    """Pure-JAX f32 reference for correctness checking."""
    h = x.reshape(-1, x.shape[1]).astype(jnp.float32)
    for i in range(num_layers):
        h = jnp.maximum(h @ params[2 * i] + params[2 * i + 1], 0.0)
    mu = h @ params[2 * num_layers] + params[2 * num_layers + 1]
    sigma = jnp.exp(h @ params[2 * num_layers + 2] + params[2 * num_layers + 3])
    return mu, sigma


if __name__ == "__main__":
    key = jax.random.PRNGKey(0)

    # --- config 1: default bf16 matmul path, 2 hidden layers, >=2 grid steps --
    num_layers = 2
    batch, input_dims, hidden_dims, latent_dims = 48, 32, 64, 16
    key, kx, kp = jax.random.split(key, 3)
    x = jax.random.normal(kx, (batch, input_dims), jnp.float32)
    params = init_encoder_params(kp, input_dims, hidden_dims, latent_dims,
                                 num_layers)
    packed_bf16 = pack_encoder_params(params, num_layers, input_dims,
                                      matmul_dtype=jnp.bfloat16)

    mu, sigma = encoder_forward(x, packed_bf16, num_layers=num_layers,
                                latent_dims=latent_dims)
    mu, sigma = jax.block_until_ready(mu), jax.block_until_ready(sigma)

    mu_ref, sigma_ref = encoder_ref(x, params, num_layers)
    assert mu.shape == (batch, latent_dims) and sigma.shape == (batch, latent_dims)
    assert jnp.allclose(mu, mu_ref, atol=1e-1, rtol=1e-1)
    assert jnp.allclose(sigma, sigma_ref, atol=1e-1, rtol=1e-1)
    assert bool(jnp.all(sigma > 0))

    # --- config 2: f32 matmul opt-in (comparable with the f32 reference) ------
    packed_f32 = pack_encoder_params(params, num_layers, input_dims,
                                     matmul_dtype=jnp.float32)
    mu32, sg32 = encoder_forward(x, packed_f32, num_layers=num_layers,
                                 latent_dims=latent_dims,
                                 matmul_dtype=jnp.float32)
    mu32, sg32 = jax.block_until_ready(mu32), jax.block_until_ready(sg32)
    assert jnp.allclose(mu32, mu_ref, atol=1e-5, rtol=1e-5)
    assert jnp.allclose(sg32, sigma_ref, atol=1e-5, rtol=1e-5)

    # --- config 3: wide latent head (split mu|sigma layout) + ragged batch ----
    num_layers3, latent3 = 1, 80
    key, kx3, kp3 = jax.random.split(key, 3)
    x3 = jax.random.normal(kx3, (19, input_dims), jnp.float32)
    params3 = init_encoder_params(kp3, input_dims, hidden_dims, latent3,
                                  num_layers3)
    packed3 = pack_encoder_params(params3, num_layers3, input_dims,
                                  matmul_dtype=jnp.bfloat16)
    mu3, sg3 = encoder_forward(x3, packed3, num_layers=num_layers3,
                               latent_dims=latent3)
    mu3, sg3 = jax.block_until_ready(mu3), jax.block_until_ready(sg3)
    mu3_ref, sg3_ref = encoder_ref(x3, params3, num_layers3)
    assert mu3.shape == (19, latent3) and sg3.shape == (19, latent3)
    assert jnp.allclose(mu3, mu3_ref, atol=1e-1, rtol=1e-1)
    assert jnp.allclose(sg3, sg3_ref, atol=1e-1, rtol=1e-1)

    print("KERNEL_OK")
</pallas_src>

<mosaic_0001>
module attributes {stable_mosaic.version = 11 : i64} {
  func.func @kernel(%arg0: i32, %arg1: memref<32x128xbf16, #tpu.memory_space<vmem>>, %arg2: memref<128x128xbf16, #tpu.memory_space<vmem>>, %arg3: memref<1x128xf32, #tpu.memory_space<vmem>>, %arg4: memref<128x128xbf16, #tpu.memory_space<vmem>>, %arg5: memref<1x128xf32, #tpu.memory_space<vmem>>, %arg6: memref<128x128xbf16, #tpu.memory_space<vmem>>, %arg7: memref<1x128xf32, #tpu.memory_space<vmem>>, %arg8: memref<32x128xf32, #tpu.memory_space<vmem>>) attributes {dimension_semantics = [#tpu.dimension_semantics<parallel>], iteration_bounds = array<i64: 2>, scalar_prefetch = 0 : i64, scratch_operands = 0 : i64, tpu.core_type = #tpu.core_type<tc>, window_params = [{transform_indices = @transform_0, window_bounds = array<i64: 32, 128>}, {pipeline_mode = #tpu.pipeline_mode<synchronous>, transform_indices = @transform_1, window_bounds = array<i64: 128, 128>}, {pipeline_mode = #tpu.pipeline_mode<synchronous>, transform_indices = @transform_2, window_bounds = array<i64: 1, 128>}, {pipeline_mode = #tpu.pipeline_mode<synchronous>, transform_indices = @transform_3, window_bounds = array<i64: 128, 128>}, {pipeline_mode = #tpu.pipeline_mode<synchronous>, transform_indices = @transform_4, window_bounds = array<i64: 1, 128>}, {pipeline_mode = #tpu.pipeline_mode<synchronous>, transform_indices = @transform_5, window_bounds = array<i64: 128, 128>}, {pipeline_mode = #tpu.pipeline_mode<synchronous>, transform_indices = @transform_6, window_bounds = array<i64: 1, 128>}, {transform_indices = @transform_7, window_bounds = array<i64: 32, 128>}]} {
    %c0 = arith.constant 0 : index
    %c0_0 = arith.constant 0 : index
    %0 = vector.load %arg1[%c0, %c0_0] : memref<32x128xbf16, #tpu.memory_space<vmem>>, vector<32x128xbf16>
    %c0_1 = arith.constant 0 : index
    %c0_2 = arith.constant 0 : index
    %1 = vector.load %arg2[%c0_1, %c0_2] : memref<128x128xbf16, #tpu.memory_space<vmem>>, vector<128x128xbf16>
    %c0_3 = arith.constant 0 : index
    %c0_4 = arith.constant 0 : index
    %2 = vector.load %arg3[%c0_3, %c0_4] : memref<1x128xf32, #tpu.memory_space<vmem>>, vector<1x128xf32>
    %cst = arith.constant dense<0.000000e+00> : vector<32x128xf32>
    %3 = tpu.matmul %0, %1, %cst {dimension_numbers = #tpu.dot_dimension_numbers<[1], [0], [0], [1], [0, 0, 1, 1], [], []>} : vector<32x128xbf16>, vector<128x128xbf16>, vector<32x128xf32> -> vector<32x128xf32>
    %4 = vector.broadcast %2 : vector<1x128xf32> to vector<32x128xf32>
    %5 = arith.addf %3, %4 : vector<32x128xf32>
    %cst_5 = arith.constant 0.000000e+00 : f32
    %6 = vector.broadcast %cst_5 : f32 to vector<32x128xf32>
    %7 = arith.maximumf %5, %6 : vector<32x128xf32>
    %8 = arith.truncf %7 : vector<32x128xf32> to vector<32x128xbf16>
    %c0_6 = arith.constant 0 : index
    %c0_7 = arith.constant 0 : index
    %9 = vector.load %arg4[%c0_6, %c0_7] : memref<128x128xbf16, #tpu.memory_space<vmem>>, vector<128x128xbf16>
    %c0_8 = arith.constant 0 : index
    %c0_9 = arith.constant 0 : index
    %10 = vector.load %arg5[%c0_8, %c0_9] : memref<1x128xf32, #tpu.memory_space<vmem>>, vector<1x128xf32>
    %cst_10 = arith.constant dense<0.000000e+00> : vector<32x128xf32>
    %11 = tpu.matmul %8, %9, %cst_10 {dimension_numbers = #tpu.dot_dimension_numbers<[1], [0], [0], [1], [0, 0, 1, 1], [], []>} : vector<32x128xbf16>, vector<128x128xbf16>, vector<32x128xf32> -> vector<32x128xf32>
    %12 = vector.broadcast %10 : vector<1x128xf32> to vector<32x128xf32>
    %13 = arith.addf %11, %12 : vector<32x128xf32>
    %cst_11 = arith.constant 0.000000e+00 : f32
    %14 = vector.broadcast %cst_11 : f32 to vector<32x128xf32>
    %15 = arith.maximumf %13, %14 : vector<32x128xf32>
    %16 = arith.truncf %15 : vector<32x128xf32> to vector<32x128xbf16>
    %c0_12 = arith.constant 0 : index
    %c0_13 = arith.constant 0 : index
    %17 = vector.load %arg6[%c0_12, %c0_13] : memref<128x128xbf16, #tpu.memory_space<vmem>>, vector<128x128xbf16>
    %c0_14 = arith.constant 0 : index
    %c0_15 = arith.constant 0 : index
    %18 = vector.load %arg7[%c0_14, %c0_15] : memref<1x128xf32, #tpu.memory_space<vmem>>, vector<1x128xf32>
    %cst_16 = arith.constant dense<0.000000e+00> : vector<32x128xf32>
    %19 = tpu.matmul %16, %17, %cst_16 {dimension_numbers = #tpu.dot_dimension_numbers<[1], [0], [0], [1], [0, 0, 1, 1], [], []>} : vector<32x128xbf16>, vector<128x128xbf16>, vector<32x128xf32> -> vector<32x128xf32>
    %20 = vector.broadcast %18 : vector<1x128xf32> to vector<32x128xf32>
    %21 = arith.addf %19, %20 : vector<32x128xf32>
    %22 = tpu.iota {dimensions = array<i32: 1>} : vector<32x128xi32>
    %c16_i32 = arith.constant 16 : i32
    %23 = vector.broadcast %c16_i32 : i32 to vector<32x128xi32>
    %24 = arith.cmpi sge, %22, %23 : vector<32x128xi32>
    %25 = math.exp %21 : vector<32x128xf32>
    %26 = arith.select %24, %25, %21 : vector<32x128xi1>, vector<32x128xf32>
    %c0_17 = arith.constant 0 : index
    %c0_18 = arith.constant 0 : index
    %27 = vector.load %arg8[%c0_17, %c0_18] : memref<32x128xf32, #tpu.memory_space<vmem>>, vector<32x128xf32>
    tpu.vector_store %arg8[%c0_17, %c0_18], %26 {strides = array<i32>} : memref<32x128xf32, #tpu.memory_space<vmem>>, vector<32x128xf32>,
    return
  }
  func.func @transform_0(%arg0: i32) -> (i32, i32) {
    %c0_i32 = arith.constant 0 : i32
    %c0_i32_0 = arith.constant 0 : i32
    return %arg0, %c0_i32 : i32, i32
  }
  func.func @transform_1(%arg0: i32) -> (i32, i32) {
    %c0_i32 = arith.constant 0 : i32
    %c0_i32_0 = arith.constant 0 : i32
    %c0_i32_1 = arith.constant 0 : i32
    return %c0_i32, %c0_i32_0 : i32, i32
  }
  func.func @transform_2(%arg0: i32) -> (i32, i32) {
    %c0_i32 = arith.constant 0 : i32
    %c0_i32_0 = arith.constant 0 : i32
    %c0_i32_1 = arith.constant 0 : i32
    return %c0_i32, %c0_i32_0 : i32, i32
  }
  func.func @transform_3(%arg0: i32) -> (i32, i32) {
    %c0_i32 = arith.constant 0 : i32
    %c0_i32_0 = arith.constant 0 : i32
    %c0_i32_1 = arith.constant 0 : i32
    return %c0_i32, %c0_i32_0 : i32, i32
  }
  func.func @transform_4(%arg0: i32) -> (i32, i32) {
    %c0_i32 = arith.constant 0 : i32
    %c0_i32_0 = arith.constant 0 : i32
    %c0_i32_1 = arith.constant 0 : i32
    return %c0_i32, %c0_i32_0 : i32, i32
  }
  func.func @transform_5(%arg0: i32) -> (i32, i32) {
    %c0_i32 = arith.constant 0 : i32
    %c0_i32_0 = arith.constant 0 : i32
    %c0_i32_1 = arith.constant 0 : i32
    return %c0_i32, %c0_i32_0 : i32, i32
  }
  func.func @transform_6(%arg0: i32) -> (i32, i32) {
    %c0_i32 = arith.constant 0 : i32
    %c0_i32_0 = arith.constant 0 : i32
    %c0_i32_1 = arith.constant 0 : i32
    return %c0_i32, %c0_i32_0 : i32, i32
  }
  func.func @transform_7(%arg0: i32) -> (i32, i32) {
    %c0_i32 = arith.constant 0 : i32
    %c0_i32_0 = arith.constant 0 : i32
    return %arg0, %c0_i32 : i32, i32
  }
}

</mosaic_0001>

<bundles_post_ra>
// kernel: encoder_forward.1
= control target key start
LH: loop header
LB: loop body
LE: loop exit
PB: predicated region body
PF: predicated region fallthrough
CT: control target
= control target key end

     0   :  { %12 = vsyncpa [#allocation3], 0  ;;  %s943_s24 = smov 0   ;;  %s1032_s0 = inlined_call_operand.vmem [shape: bf16[64,128], index: 0, kind: input, shape index: {}]   ;;  %s1033_s1 = inlined_call_operand.vmem [shape: bf16[128,128], index: 1, kind: input, shape index: {}]   ;;  %s1034_s2 = inlined_call_operand.vmem [shape: f32[1,128], index: 2, kind: input, shape index: {}]   ;;  %s1035_s3 = inlined_call_operand.vmem [shape: bf16[128,128], index: 3, kind: input, shape index: {}]   ;;  %s1036_s4 = inlined_call_operand.vmem [shape: f32[1,128], index: 4, kind: input, shape index: {}]   ;;  %s1037_s5 = inlined_call_operand.hbm [shape: bf16[128,128], index: 5, kind: input, shape index: {}]   ;;  %s1038_s6 = inlined_call_operand.vmem [shape: f32[1,128], index: 6, kind: input, shape index: {}]   ;;  %s1039_s7 = inlined_call_operand.vmem [shape: f32[64,128], index: 7, kind: output, shape index: {}]  }
   0x1 LB: > { %s224_s27 = sshll.u32 %s1037_s5, 4  ;;  %s675_s28 = sadd.s32 4294967295, %s898_s24   ;;  %s898_s24 = sphi %s943_s24, %s18_s24   ;;  %s225_s27 = int_to_ptr.hbm [resolvable:$true] %s224_s27 }
   0x2   : > { %p677_p0 = scmp.ge.s32.totalorder %s898_s24, 1  ;;  %p201_p1 = scmp.lt.s32.totalorder %s898_s24, 3 }
   0x3   : > { %p834_p2 = scmp.eq.s32.totalorder %s675_s28, 0  ;;  %s900_s29 = smov [#allocation2]  }
   0x4   : > { %p202_p3 = pnand %p677_p0, %p201_p1  ;;  %s226_s30 = sshll.u32 %s900_s29, 4  ;;  %s227_s30 = int_to_ptr.vmem [resolvable:$true] %s226_s30 }
   0x5   : > { %s901_s8 = smov 64   ;;  %s902_s9 = smov 4  }
   0x6   : > { %p830_p4 = pneg %p202_p3  ;;  %254 = sbr.rel (%p202_p3) target bundleno = 493 (0x1ed), region = 48 }
   0x8   : > { %p831_p5 = pnand %p834_p2, %p830_p4 }
   0xa   : > { %833 = dma.hbm_to_vmem [thread:$0]  (!%p831_p5), %s225_s27, 1024, %s227_s30, [#allocation3], %s901_s8, %s901_s8, %s902_s9  }
   0xb   : > { %893 = dma.done.wait (%p834_p2), [#allocation3], 1024  }
   0xc   : > { %895 = vsyncadd (%p834_p2), [#allocation3], 4294966272  ;;  %v801_v0 = vld [vmem:[%s1033_s1 + $0x38] sm:$0xff]  ;;  %v800_v1 = vld [vmem:[%s1033_s1 + $0x30] sm:$0xff]  ;;  %s682_s25 = sshll.u32 %s675_s28, 2  ;;  %v588_v59 = vlaneseq }
   0xd   : > { %383 = vmatpush.bf16.msra.mxu0 %v801_v0  ;;  %818 = vmatpush.bf16.msra.mxu3 %v801_v0  ;;  %v809_v2 = vld [vmem:[%s1035_s3 + $0x38] sm:$0xff]  ;;  %v808_v3 = vld [vmem:[%s1035_s3 + $0x30] sm:$0xff]  ;;  %v799_v4 = vld [vmem:[%s1033_s1 + $0x28] sm:$0xff]  ;;  %p288_p6 = scmp.lt.s32.totalorder %s682_s25, 7 }
   0xe   : > { %476 = vmatpush.bf16.msra.mxu1 %v809_v2  ;;  %v807_v5 = vld [vmem:[%s1035_s3 + $0x28] sm:$0xff]  ;;  %v798_v6 = vld [vmem:[%s1033_s1 + $0x20] sm:$0xff]  ;;  %v797_v8 = vld [vmem:[%s1033_s1 + $0x18] sm:$0xff]  ;;  %v589_v61 = vand.u32 127, %v588_v59 }
   0xf   : > { %v806_v7 = vld [vmem:[%s1035_s3 + $0x20] sm:$0xff]  ;;  %v796_v9 = vld [vmem:[%s1033_s1 + $0x10] sm:$0xff]  ;;  %s1041_s25 = smov (!%p288_p6, %s682_s25), 7  ;;  %v795_v10 = vld [vmem:[%s1033_s1 + $0x8] sm:$0xff] }
  0x10   : > { %s683_s11 = sshll.u32 %s1041_s25, 2  ;;  %v794_v11 = vld [vmem:[%s1033_s1] sm:$0xff]  ;;  %v805_v14 = vld [vmem:[%s1035_s3 + $0x18] sm:$0xff]  ;;  %v804_v15 = vld [vmem:[%s1035_s3 + $0x10] sm:$0xff]  ;;  %s685_s10 = sshll.u32 %s1041_s25, 3  ;;  %vm590_vm0 = vcmp.ge.s32.totalorder %v589_v61, 16 }
  0x11   : > { %384 = vmatpush.bf16.msra.mxu0 %v800_v1  ;;  %819 = vmatpush.bf16.msra.mxu3 %v800_v1  ;;  %s291_s16 = scalar_lea.vmem %s1032_s0, %s683_s11  ;;  %v803_v16 = vld [vmem:[%s1035_s3 + $0x8] sm:$0xff]  ;;  %v802_v17 = vld [vmem:[%s1035_s3] sm:$0xff]  ;;  %v817_v18 = vld [vmem:[#allocation2 + $0x38] sm:$0xff]  ;;  %s297_s13 = scalar_lea.vmem %s1039_s7, %s685_s10 }
  0x12   : > { %477 = vmatpush.bf16.msra.mxu1 %v808_v3  ;;  %v792_v12 = vld [vmem:[%s291_s16] sm:$0xff]  ;;  %v793_v13 = vld [vmem:[%s291_s16 + $0x8] sm:$0xff]  ;;  %569 = vmatpush.bf16.msra.mxu2 %v817_v18  ;;  %v816_v20 = vld [vmem:[#allocation2 + $0x30] sm:$0xff] }
  0x13   : > { %v847_v21 = vld [vmem:[%s1034_s2] ss:$0 sm:$0xff]  ;;  %v815_v22 = vld [vmem:[#allocation2 + $0x28] sm:$0xff]  ;;  %v813_v37 = vld [vmem:[#allocation2 + $0x18] sm:$0xff] }
  0x14   : > { %v814_v27 = vld [vmem:[#allocation2 + $0x20] sm:$0xff]  ;;  %v812_v38 = vld [vmem:[#allocation2 + $0x10] sm:$0xff]  ;;  %v811_v39 = vld [vmem:[#allocation2 + $0x8] sm:$0xff] }
  0x15   : > { %385 = vmatpush.bf16.msra.mxu0 %v799_v4  ;;  %820 = vmatpush.bf16.msra.mxu3 %v799_v4  ;;  %v810_v40 = vld [vmem:[#allocation2] sm:$0xff] }
  0x16   : > { %478 = vmatpush.bf16.msra.mxu1 %v807_v5  ;;  %570 = vmatpush.bf16.msra.mxu2 %v816_v20  ;;  %v848_v42 = vld [vmem:[%s1036_s4] ss:$0 sm:$0xff] }
  0x17   : > { %v849_v56 = vld [vmem:[%s1038_s6] ss:$0 sm:$0xff] }
  0x19   : > { %386 = vmatpush.bf16.msra.mxu0 %v798_v6  ;;  %821 = vmatpush.bf16.msra.mxu3 %v798_v6 }
  0x1a   : > { %479 = vmatpush.bf16.msra.mxu1 %v806_v7  ;;  %571 = vmatpush.bf16.msra.mxu2 %v815_v22 }
  0x1d   : > { %387 = vmatpush.bf16.msra.mxu0 %v797_v8  ;;  %822 = vmatpush.bf16.msra.mxu3 %v797_v8 }
  0x1e   : > { %480 = vmatpush.bf16.msra.mxu1 %v805_v14  ;;  %572 = vmatpush.bf16.msra.mxu2 %v814_v27 }
  0x21   : > { %388 = vmatpush.bf16.msra.mxu0 %v796_v9  ;;  %823 = vmatpush.bf16.msra.mxu3 %v796_v9 }
  0x22   : > { %481 = vmatpush.bf16.msra.mxu1 %v804_v15  ;;  %573 = vmatpush.bf16.msra.mxu2 %v813_v37 }
  0x25   : > { %389 = vmatpush.bf16.msra.mxu0 %v795_v10  ;;  %824 = vmatpush.bf16.msra.mxu3 %v795_v10 }
  0x26   : > { %482 = vmatpush.bf16.msra.mxu1 %v803_v16  ;;  %574 = vmatpush.bf16.msra.mxu2 %v812_v38 }
  0x29   : > { %390 = vmatpush.bf16.msra.mxu0 %v794_v11  ;;  %825 = vmatpush.bf16.msra.mxu3 %v794_v11 }
  0x2a   : > { %483 = vmatpush.bf16.msra.mxu1 %v802_v17  ;;  %575 = vmatpush.bf16.msra.mxu2 %v811_v39 }
  0x2c   : > { %391 = vmatmul.bf16.vlgmr.msra.gmra.mxu0 %v792_v12  ;;  %396 = vmatmul.bf16.vlgmr.msra.gmra.mxu3 %v793_v13 }
  0x2e   : > { %576 = vmatpush.bf16.msra.mxu2 %v810_v40 }
  0xa9   : > { %v392_v19 = vpop.f32.mrf.mxu0 }
  0xaa   : > { %v393_v23 = vadd.f32 %v847_v21, %v392_v19 }
  0xac   : > { %v402_v28 = vmax.f32 %v393_v23, 0.0 }
  0xaf   : > { %v397_v25 = vpop.f32.mrf.mxu3 }
  0xb0   : > { %v398_v32 = vadd.f32 %v847_v21, %v397_v25 }
  0xb1   : > { %v394_v24 = vpop.f32.mrf.mxu0 }
  0xb2   : > { %v395_v26 = vadd.f32 %v847_v21, %v394_v24  ;;  %v404_v34 = vmax.f32 %v398_v32, 0.0 }
  0xb4   : > { %v403_v29 = vmax.f32 %v395_v26, 0.0 }
  0xb6   : > { %v406_v30 = vpack.c.bf16 %v403_v29, %v402_v28 }
  0xb7   : > { %v399_v31 = vpop.f32.mrf.mxu3 }
  0xb8   : > { %484 = vmatmul.bf16.vlgmr.msra.gmra.mxu1 %v406_v30  ;;  %v400_v33 = vadd.f32 %v847_v21, %v399_v31 }
  0xba   : > { %v405_v35 = vmax.f32 %v400_v33, 0.0 }
  0xbc   : > { %v407_v36 = vpack.c.bf16 %v405_v35, %v404_v34 }
  0xc8   : > { %489 = vmatmul.bf16.gmra.mxu1 %v407_v36 }
 0x135   : > { %v485_v41 = vpop.f32.mrf.mxu1 }
 0x136   : > { %v486_v43 = vadd.f32 %v848_v42, %v485_v41 }
 0x138   : > { %v495_v46 = vmax.f32 %v486_v43, 0.0 }
 0x13d   : > { %v487_v44 = vpop.f32.mrf.mxu1 }
 0x13e   : > { %v488_v45 = vadd.f32 %v848_v42, %v487_v44 }
 0x140   : > { %v496_v47 = vmax.f32 %v488_v45, 0.0 }
 0x142   : > { %v499_v48 = vpack.c.bf16 %v496_v47, %v495_v46 }
 0x144   : > { %577 = vmatmul.bf16.vlgmr.msra.gmra.mxu2 %v499_v48 }
 0x145   : > { %v490_v49 = vpop.f32.mrf.mxu1 }
 0x146   : > { %v491_v50 = vadd.f32 %v848_v42, %v490_v49 }
 0x148   : > { %v497_v53 = vmax.f32 %v491_v50, 0.0 }
 0x14d   : > { %v492_v51 = vpop.f32.mrf.mxu1 }
 0x14e   : > { %v493_v52 = vadd.f32 %v848_v42, %v492_v51 }
 0x150   : > { %v498_v54 = vmax.f32 %v493_v52, 0.0 }
 0x152   : > { %v500_v55 = vpack.c.bf16 %v498_v54, %v497_v53 }
 0x154   : > { %582 = vmatmul.bf16.gmra.mxu2 %v500_v55 }
 0x1c7   : > { %v578_v57 = vpop.f32.mrf.mxu2 }
 0x1c8   : > { %v579_v58 = vadd.f32 %v849_v56, %v578_v57 }
 0x1ca   : > { %v591_v60 = vmul.f32 1.442695, %v579_v58 }
 0x1cc   : > { %850 = vpow2.f32 %v591_v60 }
 0x1cf   : > { %v580_v62 = vpop.f32.mrf.mxu2 }
 0x1d0   : > { %v581_v63 = vadd.f32 %v849_v56, %v580_v62 }
 0x1d2   : > { %v851_v0 = vpop.eup %850  ;;  %v593_v1 = vmul.f32 1.442695, %v581_v63 }
 0x1d3   : > { %v599_v2 = vsel %vm590_vm0, %v851_v0, %v579_v58 }
 0x1d4   : > { %603 = vst [vmem:[%s297_s13] sm:$0xff] %v599_v2  ;;  %852 = vpow2.f32 %v593_v1 }
 0x1d7   : > { %v583_v3 = vpop.f32.mrf.mxu2 }
 0x1d8   : > { %v584_v4 = vadd.f32 %v849_v56, %v583_v3 }
 0x1da   : > { %v853_v5 = vpop.eup %852  ;;  %v595_v6 = vmul.f32 1.442695, %v584_v4 }
 0x1db   : > { %v600_v7 = vsel %vm590_vm0, %v853_v5, %v581_v63 }
 0x1dc   : > { %604 = vst [vmem:[%s297_s13 + $0x8] sm:$0xff] %v600_v7  ;;  %854 = vpow2.f32 %v595_v6 }
 0x1df   : > { %v585_v8 = vpop.f32.mrf.mxu2 }
 0x1e0   : > { %v586_v9 = vadd.f32 %v849_v56, %v585_v8 }
 0x1e2   : > { %v855_v10 = vpop.eup %854  ;;  %v597_v11 = vmul.f32 1.442695, %v586_v9 }
 0x1e3   : > { %v601_v12 = vsel %vm590_vm0, %v855_v10, %v584_v4 }
 0x1e4   : > { %605 = vst [vmem:[%s297_s13 + $0x10] sm:$0xff] %v601_v12  ;;  %856 = vpow2.f32 %v597_v11 }
 0x1ea   : > { %v857_v13 = vpop.eup %856 }
 0x1eb   : > { %v602_v14 = vsel %vm590_vm0, %v857_v13, %v586_v9 }
 0x1ec   : > { %606 = vst [vmem:[%s297_s13 + $0x18] sm:$0xff] %v602_v14 }
 0x1ed PF: > { %s18_s24 = sadd.s32 1, %s898_s24  }
 0x1ee   : > { %p15_p7 = scmp.ge.s32.totalorder %s18_s24, 4  }
 0x1f0   :  { %17 = sbr.rel (!%p15_p7) target bundleno = 1 (0x1), region = 83 }
 0x1f5   :  { %629 = vsyncpa [#allocation3], 1 }
 0x1f6   :  { %631 = vsyncpa [#allocation3 + $0x1], 1 }

</bundles_post_ra>
